<compile_context>
chip_gen: v5e
topology: v5e:2x2
jax: 0.10.0
libtpu: 0.0.40
codegen_flags: <defaults>
</compile_context>

<pallas_src>
import functools

import jax
import jax.numpy as jnp
from jax.experimental import pallas as pl
from jax.experimental.pallas import tpu as pltpu


def _round_up(v, m):
    return (v + m - 1) // m * m


# ----------------------------------------------------------------------------
# Pallas kernel: build `cond` and `x` from pre/gt poses and aud via sliding
# windows.  Single invocation, single dense store per output.
# ----------------------------------------------------------------------------
def _cond_window_kernel(pre_ref, gt_ref, aud_ref, cond_ref, x_ref, *,
                        pose_dim, aud_dim, num_pre, win, num_steps):
    # pre_ref : (B, pose_dim, num_pre)
    # gt_ref  : (B, pose_dim, 50 - num_pre)
    # aud_ref : (B, aud_dim, 75)          only [..., :num_steps + win - 1] read
    # cond_ref: (B, cond_ch_pad, t_pad)   lane-dense padded output
    # x_ref   : (B, pose_dim_pad, t_pad)  lane-dense padded output
    pre = pre_ref[...]
    gt = gt_ref[...]
    aud = aud_ref[...]
    dtype = pre.dtype
    B = pre.shape[0]

    # Pose concat happens in vregs (no HBM round-trip in the wrapper).
    poses = jnp.concatenate([pre, gt], axis=-1)              # (B, pose_dim, 50)

    cond_ch = pose_dim * num_pre + aud_dim * win
    ch_out, t_out = cond_ref.shape[1], cond_ref.shape[2]

    # Row order matches the torch module: pose windows first (row = c*num_pre+i),
    # then audio windows (row = base + c*win + i).  Each piece is a static
    # lane-shifted slice; all placement happens in registers, then one store.
    pieces = [poses[:, c:c + 1, i:i + num_steps]
              for c in range(pose_dim) for i in range(num_pre)]
    pieces += [aud[:, c:c + 1, i:i + num_steps]
               for c in range(aud_dim) for i in range(win)]
    if ch_out > cond_ch:
        pieces.append(jnp.zeros((B, ch_out - cond_ch, num_steps), dtype))
    cond = jnp.concatenate(pieces, axis=1)                   # (B, ch_out, 45)
    if t_out > num_steps:
        cond = jnp.concatenate(
            [cond, jnp.zeros((B, ch_out, t_out - num_steps), dtype)], axis=-1)
    cond_ref[...] = cond.astype(cond_ref.dtype)              # one unmasked store

    # x = poses shifted by num_pre (the "current" frame of each step)
    x = poses[:, :, num_pre:num_pre + num_steps]             # (B, pose_dim, 45)
    x_ch, x_t = x_ref.shape[1], x_ref.shape[2]
    if x_ch > pose_dim:
        x = jnp.concatenate(
            [x, jnp.zeros((B, x_ch - pose_dim, num_steps), dtype)], axis=1)
    if x_t > num_steps:
        x = jnp.concatenate(
            [x, jnp.zeros((B, x_ch, x_t - num_steps), dtype)], axis=-1)
    x_ref[...] = x.astype(x_ref.dtype)                       # one unmasked store


# ----------------------------------------------------------------------------
# Wrapper: mirrors Generator.forward (training=True) semantics.
# ----------------------------------------------------------------------------
def generator_forward_training(aud, pre_poses, gt_poses, *, pose_dim,
                               num_pre_poses, n_lookahead):
    B, p_dim, t_pre = pre_poses.shape
    t_poses = t_pre + gt_poses.shape[2]
    aud_dim, t_aud = aud.shape[1], aud.shape[2]
    assert p_dim == pose_dim and t_poses == 50 and t_aud == 75

    # The torch module truncates aud to t_poses + n_lookahead when longer; the
    # kernel only ever reads aud[..., :num_steps + win - 1] (< that bound), so
    # no HBM copy / slice is materialized here.
    t_aud_eff = min(t_aud, t_poses + n_lookahead)
    num_steps = min(t_poses - num_pre_poses,
                    t_aud_eff - n_lookahead - num_pre_poses)
    assert num_steps == 45
    frame_end = t_aud_eff - n_lookahead - num_pre_poses - 1
    assert frame_end + 1 == num_steps

    win = num_pre_poses + 1 + n_lookahead
    cond_ch = pose_dim * num_pre_poses + aud_dim * win

    dtype = pre_poses.dtype
    sub_mult = 32 // jnp.dtype(dtype).itemsize        # 8 (f32) / 16 (bf16)
    ch_cond_pad = _round_up(cond_ch, sub_mult)
    ch_x_pad = _round_up(pose_dim, sub_mult)
    t_pad = _round_up(num_steps, 128)                 # lane-dense output stores

    kernel = functools.partial(
        _cond_window_kernel, pose_dim=pose_dim, aud_dim=aud_dim,
        num_pre=num_pre_poses, win=win, num_steps=num_steps)

    cond_p, x_p = pl.pallas_call(
        kernel,
        out_shape=(
            jax.ShapeDtypeStruct((B, ch_cond_pad, t_pad), dtype),
            jax.ShapeDtypeStruct((B, ch_x_pad, t_pad), dtype),
        ),
        grid=(1,),   # whole problem (~50 KB) fits one VMEM block: one grid step
        in_specs=[
            pl.BlockSpec(pre_poses.shape, lambda i: (0, 0, 0)),
            pl.BlockSpec(gt_poses.shape, lambda i: (0, 0, 0)),
            pl.BlockSpec(aud.shape, lambda i: (0, 0, 0)),
        ],
        out_specs=(
            pl.BlockSpec((B, ch_cond_pad, t_pad), lambda i: (0, 0, 0)),
            pl.BlockSpec((B, ch_x_pad, t_pad), lambda i: (0, 0, 0)),
        ),
        compiler_params=pltpu.CompilerParams(
            dimension_semantics=("arbitrary",)),
    )(pre_poses, gt_poses, aud)

    # Slice the padded, lane-dense tiles back to the logical shapes (cheap;
    # fuses with downstream consumers).
    cond = cond_p[:, :cond_ch, :num_steps]
    x = x_p[:, :pose_dim, :num_steps]

    # TODO(synk): z, nll = self.graph(x=x, cond=cond)  (external Glow model)
    return x, cond


# ----------------------------------------------------------------------------
# Pure-JAX reference (mirrors the torch indexing) for a correctness check.
# ----------------------------------------------------------------------------
def _reference(aud, pre_poses, gt_poses, *, num_pre_poses, n_lookahead):
    poses = jnp.concatenate([pre_poses, gt_poses], axis=2)
    aud = aud[..., :poses.shape[2] + n_lookahead]
    B = poses.shape[0]
    num_steps = 45
    t = jnp.arange(num_steps)
    win = num_pre_poses + 1 + n_lookahead

    pre_cond = jnp.stack([poses[:, :, t + i] for i in range(num_pre_poses)],
                         axis=2).reshape(B, -1, num_steps)
    aud_cond = jnp.stack([aud[:, :, t + i] for i in range(win)],
                         axis=2).reshape(B, -1, num_steps)
    cond = jnp.concatenate([pre_cond, aud_cond], axis=1)
    x = poses[:, :, t + num_pre_poses]
    return x, cond


if __name__ == "__main__":
    # Shapes implied by the module's asserts:
    #   poses time = 50, aud time = 75, num_steps = 45  =>  num_pre_poses = 5
    B = 2
    pose_dim = 4
    aud_dim = 4
    num_pre_poses = 5
    n_lookahead = 10          # window = 5 + 1 + 10 = 16

    key = jax.random.PRNGKey(0)
    k1, k2, k3 = jax.random.split(key, 3)
    aud = jax.random.normal(k1, (B, aud_dim, 75), dtype=jnp.float32)
    pre_poses = jax.random.normal(k2, (B, pose_dim, num_pre_poses), dtype=jnp.float32)
    gt_poses = jax.random.normal(k3, (B, pose_dim, 50 - num_pre_poses), dtype=jnp.float32)

    x, cond = generator_forward_training(
        aud, pre_poses, gt_poses,
        pose_dim=pose_dim, num_pre_poses=num_pre_poses, n_lookahead=n_lookahead)
    jax.block_until_ready((x, cond))

    x_ref, cond_ref = _reference(
        aud, pre_poses, gt_poses,
        num_pre_poses=num_pre_poses, n_lookahead=n_lookahead)

    assert x.shape == (B, pose_dim, 45)
    assert cond.shape == (B, pose_dim * num_pre_poses
                          + aud_dim * (num_pre_poses + 1 + n_lookahead), 45)
    assert jnp.allclose(x, x_ref), "x mismatch"
    assert jnp.allclose(cond, cond_ref), "cond mismatch"

    print("KERNEL_OK")
</pallas_src>

<mosaic_0001>
module attributes {stable_mosaic.version = 11 : i64} {
  func.func @_cond_window_kernel(%arg0: i32, %arg1: memref<2x4x5xf32, #tpu.memory_space<vmem>>, %arg2: memref<2x4x45xf32, #tpu.memory_space<vmem>>, %arg3: memref<2x4x75xf32, #tpu.memory_space<vmem>>, %arg4: memref<2x88x128xf32, #tpu.memory_space<vmem>>, %arg5: memref<2x8x128xf32, #tpu.memory_space<vmem>>) attributes {dimension_semantics = [#tpu.dimension_semantics<arbitrary>], iteration_bounds = array<i64: 1>, scalar_prefetch = 0 : i64, scratch_operands = 0 : i64, tpu.core_type = #tpu.core_type<tc>, window_params = [{pipeline_mode = #tpu.pipeline_mode<synchronous>, transform_indices = @transform_0, window_bounds = array<i64: 2, 4, 5>}, {pipeline_mode = #tpu.pipeline_mode<synchronous>, transform_indices = @transform_1, window_bounds = array<i64: 2, 4, 45>}, {pipeline_mode = #tpu.pipeline_mode<synchronous>, transform_indices = @transform_2, window_bounds = array<i64: 2, 4, 75>}, {pipeline_mode = #tpu.pipeline_mode<synchronous>, transform_indices = @transform_3, window_bounds = array<i64: 2, 88, 128>}, {pipeline_mode = #tpu.pipeline_mode<synchronous>, transform_indices = @transform_4, window_bounds = array<i64: 2, 8, 128>}]} {
    %c0 = arith.constant 0 : index
    %c0_0 = arith.constant 0 : index
    %c0_1 = arith.constant 0 : index
    %0 = vector.load %arg1[%c0, %c0_0, %c0_1] : memref<2x4x5xf32, #tpu.memory_space<vmem>>, vector<2x4x5xf32>
    %c0_2 = arith.constant 0 : index
    %c0_3 = arith.constant 0 : index
    %c0_4 = arith.constant 0 : index
    %1 = vector.load %arg2[%c0_2, %c0_3, %c0_4] : memref<2x4x45xf32, #tpu.memory_space<vmem>>, vector<2x4x45xf32>
    %c0_5 = arith.constant 0 : index
    %c0_6 = arith.constant 0 : index
    %c0_7 = arith.constant 0 : index
    %2 = vector.load %arg3[%c0_5, %c0_6, %c0_7] : memref<2x4x75xf32, #tpu.memory_space<vmem>>, vector<2x4x75xf32>
    %3 = tpu.concatenate %0, %1 in 2 : vector<2x4x5xf32>, vector<2x4x45xf32> -> vector<2x4x50xf32>
    %4 = vector.extract_strided_slice %3 {offsets = [0, 0, 0], sizes = [2, 1, 45], strides = [1, 1, 1]} : vector<2x4x50xf32> to vector<2x1x45xf32>
    %5 = vector.extract_strided_slice %3 {offsets = [0, 0, 1], sizes = [2, 1, 45], strides = [1, 1, 1]} : vector<2x4x50xf32> to vector<2x1x45xf32>
    %6 = vector.extract_strided_slice %3 {offsets = [0, 0, 2], sizes = [2, 1, 45], strides = [1, 1, 1]} : vector<2x4x50xf32> to vector<2x1x45xf32>
    %7 = vector.extract_strided_slice %3 {offsets = [0, 0, 3], sizes = [2, 1, 45], strides = [1, 1, 1]} : vector<2x4x50xf32> to vector<2x1x45xf32>
    %8 = vector.extract_strided_slice %3 {offsets = [0, 0, 4], sizes = [2, 1, 45], strides = [1, 1, 1]} : vector<2x4x50xf32> to vector<2x1x45xf32>
    %9 = vector.extract_strided_slice %3 {offsets = [0, 1, 0], sizes = [2, 1, 45], strides = [1, 1, 1]} : vector<2x4x50xf32> to vector<2x1x45xf32>
    %10 = vector.extract_strided_slice %3 {offsets = [0, 1, 1], sizes = [2, 1, 45], strides = [1, 1, 1]} : vector<2x4x50xf32> to vector<2x1x45xf32>
    %11 = vector.extract_strided_slice %3 {offsets = [0, 1, 2], sizes = [2, 1, 45], strides = [1, 1, 1]} : vector<2x4x50xf32> to vector<2x1x45xf32>
    %12 = vector.extract_strided_slice %3 {offsets = [0, 1, 3], sizes = [2, 1, 45], strides = [1, 1, 1]} : vector<2x4x50xf32> to vector<2x1x45xf32>
    %13 = vector.extract_strided_slice %3 {offsets = [0, 1, 4], sizes = [2, 1, 45], strides = [1, 1, 1]} : vector<2x4x50xf32> to vector<2x1x45xf32>
    %14 = vector.extract_strided_slice %3 {offsets = [0, 2, 0], sizes = [2, 1, 45], strides = [1, 1, 1]} : vector<2x4x50xf32> to vector<2x1x45xf32>
    %15 = vector.extract_strided_slice %3 {offsets = [0, 2, 1], sizes = [2, 1, 45], strides = [1, 1, 1]} : vector<2x4x50xf32> to vector<2x1x45xf32>
    %16 = vector.extract_strided_slice %3 {offsets = [0, 2, 2], sizes = [2, 1, 45], strides = [1, 1, 1]} : vector<2x4x50xf32> to vector<2x1x45xf32>
    %17 = vector.extract_strided_slice %3 {offsets = [0, 2, 3], sizes = [2, 1, 45], strides = [1, 1, 1]} : vector<2x4x50xf32> to vector<2x1x45xf32>
    %18 = vector.extract_strided_slice %3 {offsets = [0, 2, 4], sizes = [2, 1, 45], strides = [1, 1, 1]} : vector<2x4x50xf32> to vector<2x1x45xf32>
    %19 = vector.extract_strided_slice %3 {offsets = [0, 3, 0], sizes = [2, 1, 45], strides = [1, 1, 1]} : vector<2x4x50xf32> to vector<2x1x45xf32>
    %20 = vector.extract_strided_slice %3 {offsets = [0, 3, 1], sizes = [2, 1, 45], strides = [1, 1, 1]} : vector<2x4x50xf32> to vector<2x1x45xf32>
    %21 = vector.extract_strided_slice %3 {offsets = [0, 3, 2], sizes = [2, 1, 45], strides = [1, 1, 1]} : vector<2x4x50xf32> to vector<2x1x45xf32>
    %22 = vector.extract_strided_slice %3 {offsets = [0, 3, 3], sizes = [2, 1, 45], strides = [1, 1, 1]} : vector<2x4x50xf32> to vector<2x1x45xf32>
    %23 = vector.extract_strided_slice %3 {offsets = [0, 3, 4], sizes = [2, 1, 45], strides = [1, 1, 1]} : vector<2x4x50xf32> to vector<2x1x45xf32>
    %24 = vector.extract_strided_slice %2 {offsets = [0, 0, 0], sizes = [2, 1, 45], strides = [1, 1, 1]} : vector<2x4x75xf32> to vector<2x1x45xf32>
    %25 = vector.extract_strided_slice %2 {offsets = [0, 0, 1], sizes = [2, 1, 45], strides = [1, 1, 1]} : vector<2x4x75xf32> to vector<2x1x45xf32>
    %26 = vector.extract_strided_slice %2 {offsets = [0, 0, 2], sizes = [2, 1, 45], strides = [1, 1, 1]} : vector<2x4x75xf32> to vector<2x1x45xf32>
    %27 = vector.extract_strided_slice %2 {offsets = [0, 0, 3], sizes = [2, 1, 45], strides = [1, 1, 1]} : vector<2x4x75xf32> to vector<2x1x45xf32>
    %28 = vector.extract_strided_slice %2 {offsets = [0, 0, 4], sizes = [2, 1, 45], strides = [1, 1, 1]} : vector<2x4x75xf32> to vector<2x1x45xf32>
    %29 = vector.extract_strided_slice %2 {offsets = [0, 0, 5], sizes = [2, 1, 45], strides = [1, 1, 1]} : vector<2x4x75xf32> to vector<2x1x45xf32>
    %30 = vector.extract_strided_slice %2 {offsets = [0, 0, 6], sizes = [2, 1, 45], strides = [1, 1, 1]} : vector<2x4x75xf32> to vector<2x1x45xf32>
    %31 = vector.extract_strided_slice %2 {offsets = [0, 0, 7], sizes = [2, 1, 45], strides = [1, 1, 1]} : vector<2x4x75xf32> to vector<2x1x45xf32>
    %32 = vector.extract_strided_slice %2 {offsets = [0, 0, 8], sizes = [2, 1, 45], strides = [1, 1, 1]} : vector<2x4x75xf32> to vector<2x1x45xf32>
    %33 = vector.extract_strided_slice %2 {offsets = [0, 0, 9], sizes = [2, 1, 45], strides = [1, 1, 1]} : vector<2x4x75xf32> to vector<2x1x45xf32>
    %34 = vector.extract_strided_slice %2 {offsets = [0, 0, 10], sizes = [2, 1, 45], strides = [1, 1, 1]} : vector<2x4x75xf32> to vector<2x1x45xf32>
    %35 = vector.extract_strided_slice %2 {offsets = [0, 0, 11], sizes = [2, 1, 45], strides = [1, 1, 1]} : vector<2x4x75xf32> to vector<2x1x45xf32>
    %36 = vector.extract_strided_slice %2 {offsets = [0, 0, 12], sizes = [2, 1, 45], strides = [1, 1, 1]} : vector<2x4x75xf32> to vector<2x1x45xf32>
    %37 = vector.extract_strided_slice %2 {offsets = [0, 0, 13], sizes = [2, 1, 45], strides = [1, 1, 1]} : vector<2x4x75xf32> to vector<2x1x45xf32>
    %38 = vector.extract_strided_slice %2 {offsets = [0, 0, 14], sizes = [2, 1, 45], strides = [1, 1, 1]} : vector<2x4x75xf32> to vector<2x1x45xf32>
    %39 = vector.extract_strided_slice %2 {offsets = [0, 0, 15], sizes = [2, 1, 45], strides = [1, 1, 1]} : vector<2x4x75xf32> to vector<2x1x45xf32>
    %40 = vector.extract_strided_slice %2 {offsets = [0, 1, 0], sizes = [2, 1, 45], strides = [1, 1, 1]} : vector<2x4x75xf32> to vector<2x1x45xf32>
    %41 = vector.extract_strided_slice %2 {offsets = [0, 1, 1], sizes = [2, 1, 45], strides = [1, 1, 1]} : vector<2x4x75xf32> to vector<2x1x45xf32>
    %42 = vector.extract_strided_slice %2 {offsets = [0, 1, 2], sizes = [2, 1, 45], strides = [1, 1, 1]} : vector<2x4x75xf32> to vector<2x1x45xf32>
    %43 = vector.extract_strided_slice %2 {offsets = [0, 1, 3], sizes = [2, 1, 45], strides = [1, 1, 1]} : vector<2x4x75xf32> to vector<2x1x45xf32>
    %44 = vector.extract_strided_slice %2 {offsets = [0, 1, 4], sizes = [2, 1, 45], strides = [1, 1, 1]} : vector<2x4x75xf32> to vector<2x1x45xf32>
    %45 = vector.extract_strided_slice %2 {offsets = [0, 1, 5], sizes = [2, 1, 45], strides = [1, 1, 1]} : vector<2x4x75xf32> to vector<2x1x45xf32>
    %46 = vector.extract_strided_slice %2 {offsets = [0, 1, 6], sizes = [2, 1, 45], strides = [1, 1, 1]} : vector<2x4x75xf32> to vector<2x1x45xf32>
    %47 = vector.extract_strided_slice %2 {offsets = [0, 1, 7], sizes = [2, 1, 45], strides = [1, 1, 1]} : vector<2x4x75xf32> to vector<2x1x45xf32>
    %48 = vector.extract_strided_slice %2 {offsets = [0, 1, 8], sizes = [2, 1, 45], strides = [1, 1, 1]} : vector<2x4x75xf32> to vector<2x1x45xf32>
    %49 = vector.extract_strided_slice %2 {offsets = [0, 1, 9], sizes = [2, 1, 45], strides = [1, 1, 1]} : vector<2x4x75xf32> to vector<2x1x45xf32>
    %50 = vector.extract_strided_slice %2 {offsets = [0, 1, 10], sizes = [2, 1, 45], strides = [1, 1, 1]} : vector<2x4x75xf32> to vector<2x1x45xf32>
    %51 = vector.extract_strided_slice %2 {offsets = [0, 1, 11], sizes = [2, 1, 45], strides = [1, 1, 1]} : vector<2x4x75xf32> to vector<2x1x45xf32>
    %52 = vector.extract_strided_slice %2 {offsets = [0, 1, 12], sizes = [2, 1, 45], strides = [1, 1, 1]} : vector<2x4x75xf32> to vector<2x1x45xf32>
    %53 = vector.extract_strided_slice %2 {offsets = [0, 1, 13], sizes = [2, 1, 45], strides = [1, 1, 1]} : vector<2x4x75xf32> to vector<2x1x45xf32>
    %54 = vector.extract_strided_slice %2 {offsets = [0, 1, 14], sizes = [2, 1, 45], strides = [1, 1, 1]} : vector<2x4x75xf32> to vector<2x1x45xf32>
    %55 = vector.extract_strided_slice %2 {offsets = [0, 1, 15], sizes = [2, 1, 45], strides = [1, 1, 1]} : vector<2x4x75xf32> to vector<2x1x45xf32>
    %56 = vector.extract_strided_slice %2 {offsets = [0, 2, 0], sizes = [2, 1, 45], strides = [1, 1, 1]} : vector<2x4x75xf32> to vector<2x1x45xf32>
    %57 = vector.extract_strided_slice %2 {offsets = [0, 2, 1], sizes = [2, 1, 45], strides = [1, 1, 1]} : vector<2x4x75xf32> to vector<2x1x45xf32>
    %58 = vector.extract_strided_slice %2 {offsets = [0, 2, 2], sizes = [2, 1, 45], strides = [1, 1, 1]} : vector<2x4x75xf32> to vector<2x1x45xf32>
    %59 = vector.extract_strided_slice %2 {offsets = [0, 2, 3], sizes = [2, 1, 45], strides = [1, 1, 1]} : vector<2x4x75xf32> to vector<2x1x45xf32>
    %60 = vector.extract_strided_slice %2 {offsets = [0, 2, 4], sizes = [2, 1, 45], strides = [1, 1, 1]} : vector<2x4x75xf32> to vector<2x1x45xf32>
    %61 = vector.extract_strided_slice %2 {offsets = [0, 2, 5], sizes = [2, 1, 45], strides = [1, 1, 1]} : vector<2x4x75xf32> to vector<2x1x45xf32>
    %62 = vector.extract_strided_slice %2 {offsets = [0, 2, 6], sizes = [2, 1, 45], strides = [1, 1, 1]} : vector<2x4x75xf32> to vector<2x1x45xf32>
    %63 = vector.extract_strided_slice %2 {offsets = [0, 2, 7], sizes = [2, 1, 45], strides = [1, 1, 1]} : vector<2x4x75xf32> to vector<2x1x45xf32>
    %64 = vector.extract_strided_slice %2 {offsets = [0, 2, 8], sizes = [2, 1, 45], strides = [1, 1, 1]} : vector<2x4x75xf32> to vector<2x1x45xf32>
    %65 = vector.extract_strided_slice %2 {offsets = [0, 2, 9], sizes = [2, 1, 45], strides = [1, 1, 1]} : vector<2x4x75xf32> to vector<2x1x45xf32>
    %66 = vector.extract_strided_slice %2 {offsets = [0, 2, 10], sizes = [2, 1, 45], strides = [1, 1, 1]} : vector<2x4x75xf32> to vector<2x1x45xf32>
    %67 = vector.extract_strided_slice %2 {offsets = [0, 2, 11], sizes = [2, 1, 45], strides = [1, 1, 1]} : vector<2x4x75xf32> to vector<2x1x45xf32>
    %68 = vector.extract_strided_slice %2 {offsets = [0, 2, 12], sizes = [2, 1, 45], strides = [1, 1, 1]} : vector<2x4x75xf32> to vector<2x1x45xf32>
    %69 = vector.extract_strided_slice %2 {offsets = [0, 2, 13], sizes = [2, 1, 45], strides = [1, 1, 1]} : vector<2x4x75xf32> to vector<2x1x45xf32>
    %70 = vector.extract_strided_slice %2 {offsets = [0, 2, 14], sizes = [2, 1, 45], strides = [1, 1, 1]} : vector<2x4x75xf32> to vector<2x1x45xf32>
    %71 = vector.extract_strided_slice %2 {offsets = [0, 2, 15], sizes = [2, 1, 45], strides = [1, 1, 1]} : vector<2x4x75xf32> to vector<2x1x45xf32>
    %72 = vector.extract_strided_slice %2 {offsets = [0, 3, 0], sizes = [2, 1, 45], strides = [1, 1, 1]} : vector<2x4x75xf32> to vector<2x1x45xf32>
    %73 = vector.extract_strided_slice %2 {offsets = [0, 3, 1], sizes = [2, 1, 45], strides = [1, 1, 1]} : vector<2x4x75xf32> to vector<2x1x45xf32>
    %74 = vector.extract_strided_slice %2 {offsets = [0, 3, 2], sizes = [2, 1, 45], strides = [1, 1, 1]} : vector<2x4x75xf32> to vector<2x1x45xf32>
    %75 = vector.extract_strided_slice %2 {offsets = [0, 3, 3], sizes = [2, 1, 45], strides = [1, 1, 1]} : vector<2x4x75xf32> to vector<2x1x45xf32>
    %76 = vector.extract_strided_slice %2 {offsets = [0, 3, 4], sizes = [2, 1, 45], strides = [1, 1, 1]} : vector<2x4x75xf32> to vector<2x1x45xf32>
    %77 = vector.extract_strided_slice %2 {offsets = [0, 3, 5], sizes = [2, 1, 45], strides = [1, 1, 1]} : vector<2x4x75xf32> to vector<2x1x45xf32>
    %78 = vector.extract_strided_slice %2 {offsets = [0, 3, 6], sizes = [2, 1, 45], strides = [1, 1, 1]} : vector<2x4x75xf32> to vector<2x1x45xf32>
    %79 = vector.extract_strided_slice %2 {offsets = [0, 3, 7], sizes = [2, 1, 45], strides = [1, 1, 1]} : vector<2x4x75xf32> to vector<2x1x45xf32>
    %80 = vector.extract_strided_slice %2 {offsets = [0, 3, 8], sizes = [2, 1, 45], strides = [1, 1, 1]} : vector<2x4x75xf32> to vector<2x1x45xf32>
    %81 = vector.extract_strided_slice %2 {offsets = [0, 3, 9], sizes = [2, 1, 45], strides = [1, 1, 1]} : vector<2x4x75xf32> to vector<2x1x45xf32>
    %82 = vector.extract_strided_slice %2 {offsets = [0, 3, 10], sizes = [2, 1, 45], strides = [1, 1, 1]} : vector<2x4x75xf32> to vector<2x1x45xf32>
    %83 = vector.extract_strided_slice %2 {offsets = [0, 3, 11], sizes = [2, 1, 45], strides = [1, 1, 1]} : vector<2x4x75xf32> to vector<2x1x45xf32>
    %84 = vector.extract_strided_slice %2 {offsets = [0, 3, 12], sizes = [2, 1, 45], strides = [1, 1, 1]} : vector<2x4x75xf32> to vector<2x1x45xf32>
    %85 = vector.extract_strided_slice %2 {offsets = [0, 3, 13], sizes = [2, 1, 45], strides = [1, 1, 1]} : vector<2x4x75xf32> to vector<2x1x45xf32>
    %86 = vector.extract_strided_slice %2 {offsets = [0, 3, 14], sizes = [2, 1, 45], strides = [1, 1, 1]} : vector<2x4x75xf32> to vector<2x1x45xf32>
    %87 = vector.extract_strided_slice %2 {offsets = [0, 3, 15], sizes = [2, 1, 45], strides = [1, 1, 1]} : vector<2x4x75xf32> to vector<2x1x45xf32>
    %cst = arith.constant 0.000000e+00 : f32
    %88 = vector.broadcast %cst : f32 to vector<2x4x45xf32>
    %89 = tpu.concatenate %4, %5, %6, %7, %8, %9, %10, %11, %12, %13, %14, %15, %16, %17, %18, %19 in 1 : vector<2x1x45xf32>, vector<2x1x45xf32>, vector<2x1x45xf32>, vector<2x1x45xf32>, vector<2x1x45xf32>, vector<2x1x45xf32>, vector<2x1x45xf32>, vector<2x1x45xf32>, vector<2x1x45xf32>, vector<2x1x45xf32>, vector<2x1x45xf32>, vector<2x1x45xf32>, vector<2x1x45xf32>, vector<2x1x45xf32>, vector<2x1x45xf32>, vector<2x1x45xf32> -> vector<2x16x45xf32>
    %90 = tpu.concatenate %20, %21, %22, %23, %24, %25, %26, %27, %28, %29, %30, %31, %32, %33, %34, %35 in 1 : vector<2x1x45xf32>, vector<2x1x45xf32>, vector<2x1x45xf32>, vector<2x1x45xf32>, vector<2x1x45xf32>, vector<2x1x45xf32>, vector<2x1x45xf32>, vector<2x1x45xf32>, vector<2x1x45xf32>, vector<2x1x45xf32>, vector<2x1x45xf32>, vector<2x1x45xf32>, vector<2x1x45xf32>, vector<2x1x45xf32>, vector<2x1x45xf32>, vector<2x1x45xf32> -> vector<2x16x45xf32>
    %91 = tpu.concatenate %36, %37, %38, %39, %40, %41, %42, %43, %44, %45, %46, %47, %48, %49, %50, %51 in 1 : vector<2x1x45xf32>, vector<2x1x45xf32>, vector<2x1x45xf32>, vector<2x1x45xf32>, vector<2x1x45xf32>, vector<2x1x45xf32>, vector<2x1x45xf32>, vector<2x1x45xf32>, vector<2x1x45xf32>, vector<2x1x45xf32>, vector<2x1x45xf32>, vector<2x1x45xf32>, vector<2x1x45xf32>, vector<2x1x45xf32>, vector<2x1x45xf32>, vector<2x1x45xf32> -> vector<2x16x45xf32>
    %92 = tpu.concatenate %52, %53, %54, %55, %56, %57, %58, %59, %60, %61, %62, %63, %64, %65, %66, %67 in 1 : vector<2x1x45xf32>, vector<2x1x45xf32>, vector<2x1x45xf32>, vector<2x1x45xf32>, vector<2x1x45xf32>, vector<2x1x45xf32>, vector<2x1x45xf32>, vector<2x1x45xf32>, vector<2x1x45xf32>, vector<2x1x45xf32>, vector<2x1x45xf32>, vector<2x1x45xf32>, vector<2x1x45xf32>, vector<2x1x45xf32>, vector<2x1x45xf32>, vector<2x1x45xf32> -> vector<2x16x45xf32>
    %93 = tpu.concatenate %68, %69, %70, %71, %72, %73, %74, %75, %76, %77, %78, %79, %80, %81, %82, %83 in 1 : vector<2x1x45xf32>, vector<2x1x45xf32>, vector<2x1x45xf32>, vector<2x1x45xf32>, vector<2x1x45xf32>, vector<2x1x45xf32>, vector<2x1x45xf32>, vector<2x1x45xf32>, vector<2x1x45xf32>, vector<2x1x45xf32>, vector<2x1x45xf32>, vector<2x1x45xf32>, vector<2x1x45xf32>, vector<2x1x45xf32>, vector<2x1x45xf32>, vector<2x1x45xf32> -> vector<2x16x45xf32>
    %94 = tpu.concatenate %84, %85, %86, %87, %88 in 1 : vector<2x1x45xf32>, vector<2x1x45xf32>, vector<2x1x45xf32>, vector<2x1x45xf32>, vector<2x4x45xf32> -> vector<2x8x45xf32>
    %95 = tpu.concatenate %89, %90, %91, %92, %93, %94 in 1 : vector<2x16x45xf32>, vector<2x16x45xf32>, vector<2x16x45xf32>, vector<2x16x45xf32>, vector<2x16x45xf32>, vector<2x8x45xf32> -> vector<2x88x45xf32>
    %cst_8 = arith.constant 0.000000e+00 : f32
    %96 = vector.broadcast %cst_8 : f32 to vector<2x88x83xf32>
    %97 = tpu.concatenate %95, %96 in 2 : vector<2x88x45xf32>, vector<2x88x83xf32> -> vector<2x88x128xf32>
    %c0_9 = arith.constant 0 : index
    %c0_10 = arith.constant 0 : index
    %c0_11 = arith.constant 0 : index
    %98 = vector.load %arg4[%c0_9, %c0_10, %c0_11] : memref<2x88x128xf32, #tpu.memory_space<vmem>>, vector<2x88x128xf32>
    tpu.vector_store %arg4[%c0_9, %c0_10, %c0_11], %97 {strides = array<i32>} : memref<2x88x128xf32, #tpu.memory_space<vmem>>, vector<2x88x128xf32>,
    %99 = vector.extract_strided_slice %3 {offsets = [0, 0, 5], sizes = [2, 4, 45], strides = [1, 1, 1]} : vector<2x4x50xf32> to vector<2x4x45xf32>
    %cst_12 = arith.constant 0.000000e+00 : f32
    %100 = vector.broadcast %cst_12 : f32 to vector<2x4x45xf32>
    %101 = tpu.concatenate %99, %100 in 1 : vector<2x4x45xf32>, vector<2x4x45xf32> -> vector<2x8x45xf32>
    %cst_13 = arith.constant 0.000000e+00 : f32
    %102 = vector.broadcast %cst_13 : f32 to vector<2x8x83xf32>
    %103 = tpu.concatenate %101, %102 in 2 : vector<2x8x45xf32>, vector<2x8x83xf32> -> vector<2x8x128xf32>
    %c0_14 = arith.constant 0 : index
    %c0_15 = arith.constant 0 : index
    %c0_16 = arith.constant 0 : index
    %104 = vector.load %arg5[%c0_14, %c0_15, %c0_16] : memref<2x8x128xf32, #tpu.memory_space<vmem>>, vector<2x8x128xf32>
    tpu.vector_store %arg5[%c0_14, %c0_15, %c0_16], %103 {strides = array<i32>} : memref<2x8x128xf32, #tpu.memory_space<vmem>>, vector<2x8x128xf32>,
    return
  }
  func.func @transform_0(%arg0: i32) -> (i32, i32, i32) {
    %c0_i32 = arith.constant 0 : i32
    %c0_i32_0 = arith.constant 0 : i32
    %c0_i32_1 = arith.constant 0 : i32
    %c0_i32_2 = arith.constant 0 : i32
    return %c0_i32, %c0_i32_0, %c0_i32_1 : i32, i32, i32
  }
  func.func @transform_1(%arg0: i32) -> (i32, i32, i32) {
    %c0_i32 = arith.constant 0 : i32
    %c0_i32_0 = arith.constant 0 : i32
    %c0_i32_1 = arith.constant 0 : i32
    %c0_i32_2 = arith.constant 0 : i32
    return %c0_i32, %c0_i32_0, %c0_i32_1 : i32, i32, i32
  }
  func.func @transform_2(%arg0: i32) -> (i32, i32, i32) {
    %c0_i32 = arith.constant 0 : i32
    %c0_i32_0 = arith.constant 0 : i32
    %c0_i32_1 = arith.constant 0 : i32
    %c0_i32_2 = arith.constant 0 : i32
    return %c0_i32, %c0_i32_0, %c0_i32_1 : i32, i32, i32
  }
  func.func @transform_3(%arg0: i32) -> (i32, i32, i32) {
    %c0_i32 = arith.constant 0 : i32
    %c0_i32_0 = arith.constant 0 : i32
    %c0_i32_1 = arith.constant 0 : i32
    %c0_i32_2 = arith.constant 0 : i32
    return %c0_i32, %c0_i32_0, %c0_i32_1 : i32, i32, i32
  }
  func.func @transform_4(%arg0: i32) -> (i32, i32, i32) {
    %c0_i32 = arith.constant 0 : i32
    %c0_i32_0 = arith.constant 0 : i32
    %c0_i32_1 = arith.constant 0 : i32
    %c0_i32_2 = arith.constant 0 : i32
    return %c0_i32, %c0_i32_0, %c0_i32_1 : i32, i32, i32
  }
}

</mosaic_0001>

<bundles_post_ra>
// kernel: tpu_custom_call.1
= control target key start
LH: loop header
LB: loop body
LE: loop exit
PB: predicated region body
PF: predicated region fallthrough
CT: control target
= control target key end

     0   :  { %10 = vsyncpa [#allocation3], 0  ;;  %s1675_s0 = inlined_call_operand.hbm [shape: f32[2,4,5], index: 0, kind: input, shape index: {}]   ;;  %s1676_s1 = inlined_call_operand.hbm [shape: f32[2,4,45], index: 1, kind: input, shape index: {}]   ;;  %s1677_s2 = inlined_call_operand.hbm [shape: f32[2,4,75], index: 2, kind: input, shape index: {}]   ;;  %s1678_s3 = inlined_call_operand.hbm [shape: f32[2,88,128], index: 3, kind: output, shape index: {0}]   ;;  %s1679_s4 = inlined_call_operand.hbm [shape: f32[2,8,128], index: 4, kind: output, shape index: {1}]  }
   0x1   :  { %11 = vsyncpa [#allocation6], 0 }
   0x2   :  { %12 = vsyncpa [#allocation4], 0 }
   0x3   :  { %13 = vsyncpa [#allocation10], 0  ;;  %s31_s17 = sshll.u32 %s1676_s1, 4  ;;  %s1002_s18 = smov [#allocation5]   ;;  %s32_s17 = int_to_ptr.hbm [resolvable:$true] %s31_s17 }
   0x4   :  { %s33_s19 = sshll.u32 %s1002_s18, 4  ;;  %s18_s22 = sshll.u32 %s1675_s0, 4  ;;  %s34_s19 = int_to_ptr.vmem [resolvable:$true] %s33_s19  ;;  %s19_s22 = int_to_ptr.hbm [resolvable:$true] %s18_s22 }
   0x5   :  { %s1003_s23 = smov 64   ;;  %s1004_s24 = smov 4  }
   0x6   :  { %39 = dma.hbm_to_vmem [thread:$0]  %s32_s17, 128, %s34_s19, [#allocation6], %s1003_s23, %s1003_s23, %s1004_s24  }
   0x7   :  { %s1005_s25 = smov [#allocation2]   ;;  %s44_s29 = sshll.u32 %s1677_s2, 4  ;;  %s45_s29 = int_to_ptr.hbm [resolvable:$true] %s44_s29 }
   0x8   :  { %s20_s26 = sshll.u32 %s1005_s25, 4  ;;  %s1006_s1 = smov [#allocation7]   ;;  %s21_s26 = int_to_ptr.vmem [resolvable:$true] %s20_s26 }
   0x9   :  { %26 = dma.hbm_to_vmem [thread:$0]  %s19_s22, 128, %s21_s26, [#allocation3], %s1003_s23, %s1003_s23, %s1004_s24  }
   0xa   :  { %s46_s30 = sshll.u32 %s1006_s1, 4  ;;  %s47_s30 = int_to_ptr.vmem [resolvable:$true] %s46_s30 }
   0xb   :  { %52 = dma.hbm_to_vmem [thread:$0]  %s45_s29, 128, %s47_s30, [#allocation6], %s1003_s23, %s1003_s23, %s1004_s24  }
   0xc   :  { %994 = dma.done.wait [#allocation3], 128  }
   0xd   :  { %995 = vsyncadd [#allocation3], 4294967168 }
   0xe   :  { %996 = dma.done.wait [#allocation6], 256  }
   0xf   :  { %997 = vsyncadd [#allocation6], 4294967040  ;;  %v67_v0 = vld [vmem:[#allocation5] sm:$0xf]  ;;  %s1007_s0 = smov 5   ;;  %s1008_s2 = smov 1  }
  0x10   :  { %73 = vrot.lane.b32.xlu0 %v67_v0, %s1007_s0  ;;  %v1070_v1 = vld [vmem:[#allocation7 + $0x4] sm:$0xf]  ;;  %v68_v3 = vld [vmem:[#allocation5 + $0x4] sm:$0xf]  ;;  %v1077_v4 = vld [vmem:[#allocation7] sm:$0xf] }
  0x11   :  { %v1073_v2 = vrot.slane %v1070_v1, 4  ;;  %v1080_v5 = vrot.slane %v1077_v4, 1  ;;  %s1009_s5 = smov 126   ;;  %v1086_v6 = vrot.slane %v1077_v4, 4  ;;  %v1091_v7 = vrot.slane %v1077_v4, 2  ;;  %s1010_s6 = smov 127  }
  0x12   :  { %s1011_s7 = smov 125   ;;  %v1098_v8 = vrot.slane %v1070_v1, 2  ;;  %v1101_v9 = vrot.slane %v1077_v4, 6  ;;  %v1106_v10 = vrot.slane %v1070_v1, 1  ;;  %s1012_s8 = smov 123   ;;  %v1113_v11 = vrot.slane %v1070_v1, 5 }
  0x13   :  { %209 = vrot.lane.b32.xlu1 %v1073_v2, %s1008_s2  ;;  %219 = vrot.lane.b32.xlu2 %v1091_v7, %s1010_s6  ;;  %v1118_v12 = vrot.slane %v1077_v4, 7  ;;  %s1013_s9 = smov 124   ;;  %s1014_s10 = smov 122   ;;  %v1124_v13 = vrot.slane %v1070_v1, 7  ;;  %v1127_v14 = vrot.slane %v1077_v4, 3  ;;  %v1132_v15 = vrot.slane %v1070_v1, 6 }
  0x14   :  { %s1015_s11 = smov 120   ;;  %v1138_v16 = vrot.slane %v1077_v4, 5  ;;  %s1016_s12 = smov 121   ;;  %v1144_v17 = vrot.slane %v1070_v1, 3  ;;  %vm79_vm0 = vcmask 39936   ;;  %vm148_vm1 = vcmask 1040384  }
  0x15   :  { %s1017_s13 = smov 119   ;;  %s1018_s14 = smov 118   ;;  %v65_v18 = vld [vmem:[#allocation2] sm:$0xf]  ;;  %v66_v24 = vld [vmem:[#allocation2 + $0x4] sm:$0xf] }
  0x16   :  { %vm151_vm2 = vcmask 1041408   ;;  %vm154_vm3 = vcmask 1042432   ;;  %vm157_vm4 = vcmask 1043456   ;;  %vm160_vm5 = vcmask 1044480   ;;  %s1019_s15 = smov 11   ;;  %s1020_s16 = smov 12  }
  0x17   :  { %vm163_vm6 = vcmask 1045504   ;;  %vm166_vm7 = vcmask 1046528   ;;  %s1021_s17 = smov 10   ;;  %s1022_s18 = smov 8   ;;  %vm747_vm8 = vcmask 367616  }
  0x18   :  { %75 = vrot.lane.b32.xlu0 %v68_v3, %s1007_s0  ;;  %s1023_s19 = smov 9   ;;  %s1024_s20 = smov 7  }
  0x19   :  { %s1025_s21 = smov 6   ;;  %s1026_s22 = smov 2  }
  0x1a   :  { %s1027_s23 = smov 3   ;;  %s1029_s25 = smov [#allocation8]  }
  0x1b   :  { %227 = vrot.lane.b32.xlu1 %v1080_v5, %s1009_s5  ;;  %229 = vrot.lane.b32.xlu2 %v1106_v10, %s1009_s5  ;;  %s810_s26 = sshll.u32 %s1029_s25, 4  ;;  %s812_s29 = sshll.u32 %s1678_s3, 4  ;;  %s811_s26 = int_to_ptr.vmem [resolvable:$true] %s810_s26  ;;  %s813_s29 = int_to_ptr.hbm [resolvable:$true] %s812_s29 }
  0x1c   :  { %s1030_s1 = smov 128   ;;  %s1031_s30 = smov [#allocation9]  }
  0x20   :  { %207 = vrot.lane.b32.xlu0 %v1086_v6, %s1008_s2 }
  0x23   :  { %235 = vrot.lane.b32.xlu1 %v1070_v1, %s1011_s7  ;;  %241 = vrot.lane.b32.xlu2 %v1118_v12, %s1013_s9 }
  0x28   :  { %221 = vrot.lane.b32.xlu0 %v1098_v8, %s1010_s6 }
  0x2b   :  { %249 = vrot.lane.b32.xlu1 %v1101_v9, %s1012_s8  ;;  %251 = vrot.lane.b32.xlu2 %v1132_v15, %s1012_s8 }
  0x30   :  { %233 = vrot.lane.b32.xlu0 %v1077_v4, %s1011_s7 }
  0x33   :  { %259 = vrot.lane.b32.xlu1 %v1113_v11, %s1014_s10  ;;  %263 = vrot.lane.b32.xlu2 %v1086_v6, %s1016_s12 }
  0x38   :  { %243 = vrot.lane.b32.xlu0 %v1124_v13, %s1013_s9 }
  0x3b   :  { %269 = vrot.lane.b32.xlu1 %v1127_v14, %s1015_s11  ;;  %271 = vrot.lane.b32.xlu2 %v1144_v17, %s1015_s11 }
  0x40   :  { %257 = vrot.lane.b32.xlu0 %v1138_v16, %s1014_s10 }
  0x43   :  { %277 = vrot.lane.b32.xlu1 %v1098_v8, %s1017_s13  ;;  %281 = vrot.lane.b32.xlu2 %v1080_v5, %s1018_s14 }
  0x48   :  { %265 = vrot.lane.b32.xlu0 %v1073_v2, %s1016_s12 }
  0x4b   :  { %315 = vrot.lane.b32.xlu1 %v1118_v12, %s1010_s6  ;;  %317 = vrot.lane.b32.xlu2 %v1124_v13, %s1010_s6 }
  0x50   :  { %275 = vrot.lane.b32.xlu0 %v1091_v7, %s1017_s13 }
  0x58   :  { %283 = vrot.lane.b32.xlu0 %v1106_v10, %s1018_s14 }
  0x6d   :  { %v1162_v23 = vpop.permute.xlu2 %219 }
  0x75   :  { %v1178_v29 = vpop.permute.xlu2 %229 }
  0x7d   :  { %v242_v34 = vpop.permute.xlu2 %241 }
  0x82   :  { %v74_v19 = vpop.permute.xlu0 %73 }
  0x83   :  { %v1155_v20 = vsel %vm79_vm0, %v65_v18, %v74_v19 }
  0x84   :  { %142 = vrot.lane.b32.xlu1 %v1155_v20, %s1013_s9  ;;  %v100_v21 = vrot.slane %v1155_v20, 5  ;;  %v84_v31 = vrot.slane %v1155_v20, 7  ;;  %v126_v32 = vrot.slane %v1155_v20, 2  ;;  %v92_v36 = vrot.slane %v1155_v20, 6 }
  0x85   :  { %v1160_v22 = vpop.permute.xlu1 %209  ;;  %v252_v44 = vpop.permute.xlu2 %251  ;;  %v1209_v48 = vrot.slane %v1155_v20, 4  ;;  %v118_v49 = vrot.slane %v1155_v20, 3  ;;  %v134_v63 = vrot.slane %v1155_v20, 1 }
  0x86   :  { %102 = vrot.lane.b32.xlu0 %v100_v21, %s1011_s7 }
  0x8a   :  { %v76_v25 = vpop.permute.xlu0 %75 }
  0x8b   :  { %v1165_v26 = vsel %vm79_vm0, %v66_v24, %v76_v25 }
  0x8c   :  { %144 = vrot.lane.b32.xlu2 %v1165_v26, %s1013_s9  ;;  %197 = vrot.lane.b32.xlu1 %v1155_v20, %s1011_s7  ;;  %v1172_v27 = vrot.slane %v1165_v26, 4  ;;  %v85_v37 = vrot.slane %v1165_v26, 7  ;;  %v135_v38 = vrot.slane %v1165_v26, 1  ;;  %v93_v41 = vrot.slane %v1165_v26, 6 }
  0x8d   :  { %v1174_v28 = vpop.permute.xlu1 %227  ;;  %v101_v42 = vrot.slane %v1165_v26, 5  ;;  %v264_v53 = vpop.permute.xlu2 %263  ;;  %v119_v56 = vrot.slane %v1165_v26, 3  ;;  %v127_v57 = vrot.slane %v1165_v26, 2 }
  0x8e   :  { %112 = vrot.lane.b32.xlu0 %v1172_v27, %s1013_s9 }
  0x92   :  { %v1180_v30 = vpop.permute.xlu0 %207 }
  0x94   :  { %199 = vrot.lane.b32.xlu2 %v1165_v26, %s1011_s7  ;;  %86 = vrot.lane.b32.xlu1 %v84_v31, %s1010_s6 }
  0x95   :  { %v1187_v33 = vpop.permute.xlu1 %235  ;;  %v272_v61 = vpop.permute.xlu2 %271 }
  0x96   :  { %128 = vrot.lane.b32.xlu0 %v126_v32, %s1009_s5 }
  0x9a   :  { %v1190_v35 = vpop.permute.xlu0 %221 }
  0x9c   :  { %94 = vrot.lane.b32.xlu2 %v92_v36, %s1009_s5  ;;  %88 = vrot.lane.b32.xlu1 %v85_v37, %s1010_s6 }
  0x9d   :  { %v250_v39 = vpop.permute.xlu1 %249  ;;  %v282_v21 = vpop.permute.xlu2 %281 }
  0x9e   :  { %138 = vrot.lane.b32.xlu0 %v135_v38, %s1011_s7 }
  0xa2   :  { %v1198_v40 = vpop.permute.xlu0 %233 }
  0xa3   :  { %v301_v43 = vsel %vm148_vm1, %v1198_v40, %v242_v34 }
  0xa4   :  { %96 = vrot.lane.b32.xlu2 %v93_v41, %s1009_s5  ;;  %104 = vrot.lane.b32.xlu1 %v101_v42, %s1011_s7  ;;  %v303_v45 = vsel %vm151_vm2, %v301_v43, %v250_v39 }
  0xa5   :  { %v260_v46 = vpop.permute.xlu1 %259  ;;  %v1269_v36 = vpop.permute.xlu2 %317 }
  0xa6   :  { %185 = vrot.lane.b32.xlu0 %v126_v32, %s1010_s6 }
  0xaa   :  { %v244_v47 = vpop.permute.xlu0 %243 }
  0xab   :  { %v302_v50 = vsel %vm148_vm1, %v1187_v33, %v244_v47 }
  0xac   :  { %110 = vrot.lane.b32.xlu2 %v1209_v48, %s1013_s9  ;;  %120 = vrot.lane.b32.xlu1 %v118_v49, %s1010_s6  ;;  %v304_v51 = vsel %vm151_vm2, %v302_v50, %v252_v44 }
  0xad   :  { %v306_v52 = vsel %vm154_vm3, %v304_v51, %v260_v46  ;;  %v270_v54 = vpop.permute.xlu1 %269 }
  0xae   :  { %193 = vrot.lane.b32.xlu0 %v135_v38, %s1009_s5 }
  0xb2   :  { %v258_v55 = vpop.permute.xlu0 %257 }
  0xb3   :  { %v305_v58 = vsel %vm154_vm3, %v303_v45, %v258_v55 }
  0xb4   :  { %122 = vrot.lane.b32.xlu2 %v119_v56, %s1010_s6  ;;  %130 = vrot.lane.b32.xlu1 %v127_v57, %s1009_s5  ;;  %v307_v59 = vsel %vm157_vm4, %v305_v58, %v264_v53 }
  0xb5   :  { %v309_v60 = vsel %vm160_vm5, %v307_v59, %v270_v54  ;;  %v278_v0 = vpop.permute.xlu1 %277 }
  0xb6   :  { %321 = vrot.lane.b32.xlu0 %v1101_v9, %s1009_s5 }
  0xba   :  { %v266_v62 = vpop.permute.xlu0 %265 }
  0xbb   :  { %v308_v3 = vsel %vm157_vm4, %v306_v52, %v266_v62 }
  0xbc   :  { %136 = vrot.lane.b32.xlu2 %v134_v63, %s1011_s7  ;;  %187 = vrot.lane.b32.xlu1 %v127_v57, %s1010_s6  ;;  %v310_v18 = vsel %vm160_vm5, %v308_v3, %v272_v61 }
  0xbd   :  { %v312_v19 = vsel %vm163_vm6, %v310_v18, %v278_v0  ;;  %v1283_v38 = vpop.permute.xlu1 %315 }
  0xbe   :  { %329 = vrot.lane.b32.xlu0 %v1113_v11, %s1011_s7 }
  0xc2   :  { %v276_v24 = vpop.permute.xlu0 %275 }
  0xc3   :  { %v311_v25 = vsel %vm163_vm6, %v309_v60, %v276_v24 }
  0xc4   :  { %191 = vrot.lane.b32.xlu2 %v134_v63, %s1009_s5  ;;  %323 = vrot.lane.b32.xlu1 %v1132_v15, %s1009_s5  ;;  %v1246_v31 = vsel %vm166_vm7, %v311_v25, %v282_v21 }
  0xc6   :  { %339 = vrot.lane.b32.xlu0 %v1086_v6, %s1019_s15 }
  0xca   :  { %v284_v32 = vpop.permute.xlu0 %283 }
  0xcb   :  { %v1251_v34 = vsel %vm166_vm7, %v312_v19, %v284_v32 }
  0xcc   :  { %327 = vrot.lane.b32.xlu2 %v1138_v16, %s1011_s7  ;;  %333 = vrot.lane.b32.xlu1 %v1138_v16, %s1020_s16 }
  0xce   :  { %347 = vrot.lane.b32.xlu0 %v1144_v17, %s1021_s17 }
  0xd4   :  { %335 = vrot.lane.b32.xlu2 %v1113_v11, %s1020_s16  ;;  %341 = vrot.lane.b32.xlu1 %v1073_v2, %s1019_s15 }
  0xd6   :  { %357 = vrot.lane.b32.xlu0 %v1080_v5, %s1022_s18 }
  0xdc   :  { %345 = vrot.lane.b32.xlu2 %v1127_v14, %s1021_s17  ;;  %351 = vrot.lane.b32.xlu1 %v1091_v7, %s1023_s19 }
  0xde   :  { %365 = vrot.lane.b32.xlu0 %v1070_v1, %s1024_s20 }
  0xe4   :  { %353 = vrot.lane.b32.xlu2 %v1098_v8, %s1023_s19  ;;  %359 = vrot.lane.b32.xlu1 %v1106_v10, %s1022_s18 }
  0xe6   :  { %v145_v37 = vpop.permute.xlu2 %144  ;;  %375 = vrot.lane.b32.xlu0 %v1101_v9, %s1007_s0 }
  0xec   :  { %363 = vrot.lane.b32.xlu2 %v1077_v4, %s1024_s20  ;;  %369 = vrot.lane.b32.xlu1 %v1118_v12, %s1025_s21 }
  0xee   :  { %v1285_v39 = vpop.permute.xlu2 %199  ;;  %383 = vrot.lane.b32.xlu0 %v1113_v11, %s1004_s24 }
  0xf4   :  { %371 = vrot.lane.b32.xlu2 %v1124_v13, %s1025_s21  ;;  %377 = vrot.lane.b32.xlu1 %v1132_v15, %s1007_s0 }
  0xf6   :  { %v143_v41 = vpop.permute.xlu1 %142  ;;  %393 = vrot.lane.b32.xlu0 %v1127_v14, %s1026_s22  ;;  %v95_v42 = vpop.permute.xlu2 %94 }
  0xf8   :  { %v103_v43 = vpop.permute.xlu0 %102 }
  0xfc   :  { %381 = vrot.lane.b32.xlu2 %v1138_v16, %s1004_s24  ;;  %387 = vrot.lane.b32.xlu1 %v1086_v6, %s1027_s23 }
  0xfe   :  { %v198_v44 = vpop.permute.xlu1 %197  ;;  %401 = vrot.lane.b32.xlu0 %v1098_v8, %s1008_s2  ;;  %v97_v45 = vpop.permute.xlu2 %96 }
 0x100   :  { %v113_v46 = vpop.permute.xlu0 %112 }
 0x104   :  { %389 = vrot.lane.b32.xlu2 %v1073_v2, %s1027_s23  ;;  %395 = vrot.lane.b32.xlu1 %v1144_v17, %s1026_s22 }
 0x106   :  { %441 = vrot.lane.b32.xlu0 %v1118_v12, %s1009_s5  ;;  %v111_v47 = vpop.permute.xlu2 %110  ;;  %v87_v50 = vpop.permute.xlu1 %86 }
 0x107   :  { %v149_v57 = vsel %vm148_vm1, %v1155_v20, %v87_v50 }
 0x108   :  { %v129_v51 = vpop.permute.xlu0 %128  ;;  %v152_v60 = vsel %vm151_vm2, %v149_v57, %v95_v42 }
 0x109   :  { %v155_v18 = vsel %vm154_vm3, %v152_v60, %v103_v43 }
 0x10a   :  { %v158_v57 = vsel %vm157_vm4, %v155_v18, %v111_v47 }
 0x10c   :  { %399 = vrot.lane.b32.xlu2 %v1091_v7, %s1008_s2  ;;  %435 = vrot.lane.b32.xlu1 %v1077_v4, %s1010_s6 }
 0x10e   :  { %449 = vrot.lane.b32.xlu0 %v1132_v15, %s1011_s7  ;;  %v123_v52 = vpop.permute.xlu2 %122  ;;  %v89_v53 = vpop.permute.xlu1 %88 }
 0x10f   :  { %v150_v25 = vsel %vm148_vm1, %v1165_v26, %v89_v53 }
 0x110   :  { %v139_v54 = vpop.permute.xlu0 %138 }
 0x111   :  { %v170_v55 = vsel %vm148_vm1, %v139_v54, %v145_v37 }
 0x112   :  { %v172_v58 = vsel %vm151_vm2, %v170_v55, %v1165_v26 }
 0x113   :  { %v174_v59 = vsel %vm154_vm3, %v172_v58, %v89_v53 }
 0x114   :  { %437 = vrot.lane.b32.xlu2 %v1070_v1, %s1010_s6  ;;  %443 = vrot.lane.b32.xlu1 %v1124_v13, %s1009_s5  ;;  %v176_v62 = vsel %vm157_vm4, %v174_v59, %v97_v45  ;;  %v153_v59 = vsel %vm151_vm2, %v150_v25, %v97_v45 }
 0x116   :  { %459 = vrot.lane.b32.xlu0 %v1138_v16, %s1019_s15  ;;  %v137_v61 = vpop.permute.xlu2 %136  ;;  %v105_v63 = vpop.permute.xlu1 %104 }
 0x117   :  { %v169_v0 = vsel %vm148_vm1, %v137_v61, %v143_v41  ;;  %v178_v3 = vsel %vm160_vm5, %v176_v62, %v105_v63 }
 0x118   :  { %v171_v19 = vsel %vm151_vm2, %v169_v0, %v1155_v20  ;;  %v180_v21 = vsel %vm163_vm6, %v178_v3, %v113_v46  ;;  %v186_v24 = vpop.permute.xlu0 %185 }
 0x119   :  { %v173_v32 = vsel %vm154_vm3, %v171_v19, %v87_v50  ;;  %v182_v37 = vsel %vm166_vm7, %v180_v21, %v1172_v27  ;;  %v156_v50 = vsel %vm154_vm3, %v153_v59, %v105_v63  ;;  %v287_v53 = vsel %vm148_vm1, %v118_v49, %v186_v24 }
 0x11a   :  { %v175_v41 = vsel %vm157_vm4, %v173_v32, %v95_v42  ;;  %v760_v54 = vsel %vm747_vm8, %v182_v37, 0.0  ;;  %v159_v63 = vsel %vm157_vm4, %v156_v50, %v113_v46  ;;  %v405_v21 = vsel %vm148_vm1, %v1077_v4, %v1283_v38 }
 0x11b   :  { %v177_v55 = vsel %vm160_vm5, %v175_v41, %v103_v43  ;;  %782 = vst [vmem:[#allocation8 + $0x60] sm:$0xff] %v760_v54 }
 0x11c   :  { %v179_v58 = vsel %vm163_vm6, %v177_v55, %v111_v47  ;;  %447 = vrot.lane.b32.xlu2 %v1101_v9, %s1011_s7  ;;  %453 = vrot.lane.b32.xlu1 %v1101_v9, %s1020_s16  ;;  %v161_v47 = vsel %vm160_vm5, %v158_v57, %v1209_v48  ;;  %v406_v57 = vsel %vm148_vm1, %v1070_v1, %v1269_v36 }
 0x11d   :  { %v181_v42 = vsel %vm166_vm7, %v179_v58, %v1209_v48  ;;  %v162_v48 = vsel %vm160_vm5, %v159_v63, %v1172_v27 }
 0x11e   :  { %v749_v43 = vsel %vm747_vm8, %v181_v42, 0.0  ;;  %467 = vrot.lane.b32.xlu0 %v1073_v2, %s1021_s17  ;;  %v192_v45 = vpop.permute.xlu2 %191  ;;  %v121_v60 = vpop.permute.xlu1 %120  ;;  %v165_v46 = vsel %vm163_vm6, %v162_v48, %v123_v52 }
 0x11f   :  { %771 = vst [vmem:[#allocation8 + $0x8] sm:$0xff] %v749_v43  ;;  %v289_v61 = vsel %vm151_vm2, %v287_v53, %v192_v45  ;;  %v164_v62 = vsel %vm163_vm6, %v161_v47, %v121_v60 }
 0x120   :  { %v1363_v0 = vsel %vm154_vm3, %v289_v61, %v198_v44  ;;  %v167_v49 = vsel %vm166_vm7, %v164_v62, %v129_v51  ;;  %v194_v3 = vpop.permute.xlu0 %193 }
 0x121   :  { %v748_v18 = vsel %vm747_vm8, %v167_v49, 0.0 }
 0x122   :  { %770 = vst [vmem:[#allocation8] sm:$0xff] %v748_v18 }
 0x124   :  { %455 = vrot.lane.b32.xlu2 %v1132_v15, %s1020_s16  ;;  %461 = vrot.lane.b32.xlu1 %v1113_v11, %s1019_s15 }
 0x126   :  { %477 = vrot.lane.b32.xlu0 %v1091_v7, %s1022_s18  ;;  %v328_v44 = vpop.permute.xlu2 %327  ;;  %v131_v51 = vpop.permute.xlu1 %130 }
 0x127   :  { %v168_v19 = vsel %vm166_vm7, %v165_v46, %v131_v51 }
 0x128   :  { %v759_v27 = vsel %vm747_vm8, %v168_v19, 0.0  ;;  %v322_v24 = vpop.permute.xlu0 %321 }
 0x129   :  { %781 = vst [vmem:[#allocation8 + $0x58] sm:$0xff] %v759_v27  ;;  %v407_v25 = vsel %vm151_vm2, %v405_v21, %v322_v24 }
 0x12a   :  { %v409_v32 = vsel %vm154_vm3, %v407_v25, %v328_v44 }
 0x12c   :  { %465 = vrot.lane.b32.xlu2 %v1086_v6, %s1021_s17  ;;  %471 = vrot.lane.b32.xlu1 %v1127_v14, %s1023_s19 }
 0x12e   :  { %485 = vrot.lane.b32.xlu0 %v1106_v10, %s1024_s20  ;;  %v336_v52 = vpop.permute.xlu2 %335  ;;  %v188_v37 = vpop.permute.xlu1 %187 }
 0x12f   :  { %v288_v38 = vsel %vm148_vm1, %v119_v56, %v188_v37 }
 0x130   :  { %v290_v41 = vsel %vm151_vm2, %v288_v38, %v194_v3  ;;  %v330_v54 = vpop.permute.xlu0 %329 }
 0x131   :  { %v1395_v55 = vsel %vm154_vm3, %v290_v41, %v1285_v39 }
 0x134   :  { %473 = vrot.lane.b32.xlu2 %v1144_v17, %s1023_s19  ;;  %479 = vrot.lane.b32.xlu1 %v1098_v8, %s1022_s18 }
 0x136   :  { %495 = vrot.lane.b32.xlu0 %v1118_v12, %s1007_s0  ;;  %v346_v56 = vpop.permute.xlu2 %345  ;;  %v324_v58 = vpop.permute.xlu1 %323 }
 0x137   :  { %v408_v59 = vsel %vm151_vm2, %v406_v57, %v324_v58 }
 0x138   :  { %v410_v39 = vsel %vm154_vm3, %v408_v59, %v330_v54  ;;  %v340_v42 = vpop.permute.xlu0 %339 }
 0x139   :  { %v412_v50 = vsel %vm157_vm4, %v410_v39, %v336_v52 }
 0x13c   :  { %483 = vrot.lane.b32.xlu2 %v1080_v5, %s1024_s20  ;;  %489 = vrot.lane.b32.xlu1 %v1077_v4, %s1025_s21 }
 0x13e   :  { %503 = vrot.lane.b32.xlu0 %v1132_v15, %s1004_s24  ;;  %v354_v36 = vpop.permute.xlu2 %353  ;;  %v334_v43 = vpop.permute.xlu1 %333 }
 0x13f   :  { %v411_v53 = vsel %vm157_vm4, %v409_v32, %v334_v43 }
 0x140   :  { %v413_v45 = vsel %vm160_vm5, %v411_v53, %v340_v42  ;;  %v348_v47 = vpop.permute.xlu0 %347 }
 0x141   :  { %v415_v60 = vsel %vm163_vm6, %v413_v45, %v346_v56 }
 0x144   :  { %491 = vrot.lane.b32.xlu2 %v1070_v1, %s1025_s21  ;;  %497 = vrot.lane.b32.xlu1 %v1124_v13, %s1007_s0 }
 0x146   :  { %513 = vrot.lane.b32.xlu0 %v1086_v6, %s1026_s22  ;;  %v364_v61 = vpop.permute.xlu2 %363  ;;  %v342_v62 = vpop.permute.xlu1 %341 }
 0x147   :  { %v414_v63 = vsel %vm160_vm5, %v412_v50, %v342_v62 }
 0x148   :  { %v358_v49 = vpop.permute.xlu0 %357  ;;  %v416_v3 = vsel %vm163_vm6, %v414_v63, %v348_v47 }
 0x149   :  { %v419_v18 = vsel %vm148_vm1, %v358_v49, %v364_v61  ;;  %v1428_v48 = vsel %vm166_vm7, %v416_v3, %v354_v36 }
 0x14c   :  { %501 = vrot.lane.b32.xlu2 %v1101_v9, %s1004_s24  ;;  %507 = vrot.lane.b32.xlu1 %v1138_v16, %s1027_s23 }
 0x14e   :  { %521 = vrot.lane.b32.xlu0 %v1144_v17, %s1008_s2  ;;  %v372_v44 = vpop.permute.xlu2 %371  ;;  %v352_v46 = vpop.permute.xlu1 %351 }
 0x14f   :  { %v1437_v51 = vsel %vm166_vm7, %v415_v60, %v352_v46 }
 0x150   :  { %v366_v19 = vpop.permute.xlu0 %365 }
 0x154   :  { %509 = vrot.lane.b32.xlu2 %v1113_v11, %s1027_s23  ;;  %515 = vrot.lane.b32.xlu1 %v1073_v2, %s1026_s22 }
 0x156   :  { %561 = vrot.lane.b32.xlu0 %v1077_v4, %s1009_s5  ;;  %v382_v21 = vpop.permute.xlu2 %381  ;;  %v360_v27 = vpop.permute.xlu1 %359 }
 0x157   :  { %v420_v24 = vsel %vm148_vm1, %v360_v27, %v366_v19 }
 0x158   :  { %v376_v25 = vpop.permute.xlu0 %375  ;;  %v422_v32 = vsel %vm151_vm2, %v420_v24, %v372_v44 }
 0x15c   :  { %519 = vrot.lane.b32.xlu2 %v1127_v14, %s1008_s2  ;;  %555 = vrot.lane.b32.xlu1 %v1080_v5, %s1010_s6 }
 0x15e   :  { %569 = vrot.lane.b32.xlu0 %v1124_v13, %s1011_s7  ;;  %v390_v52 = vpop.permute.xlu2 %389  ;;  %v370_v37 = vpop.permute.xlu1 %369 }
 0x15f   :  { %v421_v38 = vsel %vm151_vm2, %v419_v18, %v370_v37 }
 0x160   :  { %v423_v41 = vsel %vm154_vm3, %v421_v38, %v376_v25  ;;  %v384_v54 = vpop.permute.xlu0 %383 }
 0x161   :  { %v425_v57 = vsel %vm157_vm4, %v423_v41, %v382_v21 }
 0x164   :  { %557 = vrot.lane.b32.xlu2 %v1106_v10, %s1010_s6  ;;  %563 = vrot.lane.b32.xlu1 %v1070_v1, %s1009_s5 }
 0x166   :  { %579 = vrot.lane.b32.xlu0 %v1101_v9, %s1019_s15  ;;  %v400_v56 = vpop.permute.xlu2 %399  ;;  %v378_v58 = vpop.permute.xlu1 %377 }
 0x167   :  { %v424_v59 = vsel %vm154_vm3, %v422_v32, %v378_v58 }
 0x168   :  { %v426_v39 = vsel %vm157_vm4, %v424_v59, %v384_v54  ;;  %v394_v42 = vpop.permute.xlu0 %393 }
 0x169   :  { %v428_v50 = vsel %vm160_vm5, %v426_v39, %v390_v52 }
 0x16c   :  { %567 = vrot.lane.b32.xlu2 %v1118_v12, %s1011_s7  ;;  %573 = vrot.lane.b32.xlu1 %v1118_v12, %s1020_s16 }
 0x16e   :  { %587 = vrot.lane.b32.xlu0 %v1113_v11, %s1021_s17  ;;  %v438_v36 = vpop.permute.xlu2 %437  ;;  %v388_v43 = vpop.permute.xlu1 %387 }
 0x16f   :  { %v427_v53 = vsel %vm160_vm5, %v425_v57, %v388_v43 }
 0x170   :  { %v402_v45 = vpop.permute.xlu0 %401  ;;  %v429_v47 = vsel %vm163_vm6, %v427_v53, %v394_v42 }
 0x171   :  { %v1474_v60 = vsel %vm166_vm7, %v429_v47, %v400_v56 }
 0x174   :  { %575 = vrot.lane.b32.xlu2 %v1124_v13, %s1020_s16  ;;  %581 = vrot.lane.b32.xlu1 %v1132_v15, %s1019_s15 }
 0x176   :  { %597 = vrot.lane.b32.xlu0 %v1127_v14, %s1022_s18  ;;  %v1482_v61 = vpop.permute.xlu2 %447  ;;  %v396_v62 = vpop.permute.xlu1 %395 }
 0x177   :  { %v430_v37 = vsel %vm163_vm6, %v428_v50, %v396_v62 }
 0x178   :  { %v442_v63 = vpop.permute.xlu0 %441  ;;  %v432_v57 = vsel %vm166_vm7, %v430_v37, %v402_v45 }
 0x17c   :  { %585 = vrot.lane.b32.xlu2 %v1138_v16, %s1021_s17  ;;  %591 = vrot.lane.b32.xlu1 %v1086_v6, %s1023_s19 }
 0x17e   :  { %605 = vrot.lane.b32.xlu0 %v1098_v8, %s1024_s20  ;;  %v456_v49 = vpop.permute.xlu2 %455  ;;  %v436_v3 = vpop.permute.xlu1 %435 }
 0x17f   :  { %v525_v54 = vsel %vm148_vm1, %v1080_v5, %v436_v3 }
 0x180   :  { %v450_v18 = vpop.permute.xlu0 %449  ;;  %v527_v42 = vsel %vm151_vm2, %v525_v54, %v442_v63 }
 0x181   :  { %v529_v43 = vsel %vm154_vm3, %v527_v42, %v1482_v61  ;;  %v668_v42 = vsel %vm148_vm1, %v1144_v17, %v1190_v35 }
 0x184   :  { %593 = vrot.lane.b32.xlu2 %v1073_v2, %s1023_s19  ;;  %599 = vrot.lane.b32.xlu1 %v1144_v17, %s1022_s18 }
 0x186   :  { %615 = vrot.lane.b32.xlu0 %v1077_v4, %s1007_s0  ;;  %v1496_v44 = vpop.permute.xlu2 %465  ;;  %v444_v46 = vpop.permute.xlu1 %443 }
 0x188   :  { %v460_v19 = vpop.permute.xlu0 %459 }
 0x18c   :  { %603 = vrot.lane.b32.xlu2 %v1091_v7, %s1024_s20  ;;  %609 = vrot.lane.b32.xlu1 %v1080_v5, %s1025_s21 }
 0x18e   :  { %623 = vrot.lane.b32.xlu0 %v1124_v13, %s1004_s24  ;;  %v474_v2 = vpop.permute.xlu2 %473  ;;  %v454_v6 = vpop.permute.xlu1 %453 }
 0x18f   :  { %v531_v5 = vsel %vm157_vm4, %v529_v43, %v454_v6 }
 0x190   :  { %v468_v21 = vpop.permute.xlu0 %467  ;;  %v533_v62 = vsel %vm160_vm5, %v531_v5, %v460_v19  ;;  %v670_v5 = vsel %vm151_vm2, %v668_v42, %v1178_v29 }
 0x191   :  { %v535_v3 = vsel %vm163_vm6, %v533_v62, %v1496_v44 }
 0x194   :  { %611 = vrot.lane.b32.xlu2 %v1106_v10, %s1025_s21  ;;  %617 = vrot.lane.b32.xlu1 %v1070_v1, %s1007_s0  ;;  %v293_v1 = vsel %vm157_vm4, %v1363_v0, %v1180_v30  ;;  %s823_s0 = sshll.u32 %s1031_s30, 4  ;;  %s824_s0 = int_to_ptr.vmem [resolvable:$true] %s823_s0 }
 0x196   :  { %633 = vrot.lane.b32.xlu0 %v1138_v16, %s1026_s22  ;;  %v484_v4 = vpop.permute.xlu2 %483  ;;  %v462_v27 = vpop.permute.xlu1 %461  ;;  %v294_v16 = vsel %vm157_vm4, %v1395_v55, %v1160_v22 }
 0x198   :  { %v478_v24 = vpop.permute.xlu0 %477 }
 0x199   :  { %v539_v63 = vsel %vm148_vm1, %v478_v24, %v484_v4 }
 0x19c   :  { %621 = vrot.lane.b32.xlu2 %v1118_v12, %s1004_s24  ;;  %627 = vrot.lane.b32.xlu1 %v1101_v9, %s1027_s23  ;;  %v526_v9 = vsel %vm148_vm1, %v1106_v10, %v438_v36  ;;  %v295_v12 = vsel %vm160_vm5, %v293_v1, %v1127_v14  ;;  %s1028_s24 = smov 116  }
 0x19e   :  { %681 = vrot.lane.b32.xlu0 %v1246_v31, %s1010_s6  ;;  %v492_v13 = vpop.permute.xlu2 %491  ;;  %v472_v25 = vpop.permute.xlu1 %471  ;;  %v296_v31 = vsel %vm160_vm5, %v294_v16, %v1144_v17 }
 0x19f   :  { %v298_v10 = vsel %vm163_vm6, %v296_v31, %v1190_v35 }
 0x1a0   :  { %v486_v32 = vpop.permute.xlu0 %485 }
 0x1a4   :  { %629 = vrot.lane.b32.xlu2 %v1132_v15, %s1027_s23  ;;  %635 = vrot.lane.b32.xlu1 %v1113_v11, %s1026_s22  ;;  %v528_v15 = vsel %vm151_vm2, %v526_v9, %v444_v46  ;;  %v297_v11 = vsel %vm163_vm6, %v295_v12, %v1162_v23 }
 0x1a5   :  { %v530_v38 = vsel %vm154_vm3, %v528_v15, %v450_v18  ;;  %v299_v41 = vsel %vm166_vm7, %v297_v11, %v1174_v28 }
 0x1a6   :  { %v502_v0 = vpop.permute.xlu2 %501  ;;  %695 = vrot.lane.b32.xlu0 %v1437_v51, %s1028_s24  ;;  %v480_v55 = vpop.permute.xlu1 %479  ;;  %v300_v51 = vsel %vm166_vm7, %v298_v10, %v1178_v29  ;;  %v532_v56 = vsel %vm157_vm4, %v530_v38, %v456_v49 }
 0x1a7   :  { %v534_v39 = vsel %vm160_vm5, %v532_v56, %v462_v27  ;;  %v540_v18 = vsel %vm148_vm1, %v480_v55, %v486_v32 }
 0x1a8   :  { %v496_v52 = vpop.permute.xlu0 %495  ;;  %v536_v36 = vsel %vm163_vm6, %v534_v39, %v468_v21  ;;  %v542_v6 = vsel %vm151_vm2, %v540_v18, %v492_v13 }
 0x1a9   :  { %v538_v53 = vsel %vm166_vm7, %v536_v36, %v474_v2 }
 0x1ac   :  { %679 = vrot.lane.b32.xlu2 %v299_v41, %s1010_s6  ;;  %683 = vrot.lane.b32.xlu1 %v300_v51, %s1010_s6 }
 0x1ae   :  { %v510_v58 = vpop.permute.xlu2 %509  ;;  %701 = vrot.lane.b32.xlu0 %v432_v57, %s1028_s24  ;;  %v490_v59 = vpop.permute.xlu1 %489 }
 0x1af   :  { %v541_v61 = vsel %vm151_vm2, %v539_v63, %v490_v59 }
 0x1b0   :  { %v504_v50 = vpop.permute.xlu0 %503 }
 0x1b4   :  { %685 = vrot.lane.b32.xlu2 %v1251_v34, %s1010_s6  ;;  %697 = vrot.lane.b32.xlu1 %v1474_v60, %s1028_s24  ;;  %v543_v34 = vsel %vm154_vm3, %v541_v61, %v496_v52  ;;  %v537_v60 = vsel %vm166_vm7, %v535_v3, %v472_v25  ;;  %s825_s6 = sshll.u32 %s1679_s4, 4  ;;  %s826_s6 = int_to_ptr.hbm [resolvable:$true] %s825_s6 }
 0x1b5   :  { %v545_v19 = vsel %vm157_vm4, %v543_v34, %v502_v0 }
 0x1b6   :  { %v520_v45 = vpop.permute.xlu2 %519  ;;  %715 = vrot.lane.b32.xlu0 %v538_v53, %s1028_s24  ;;  %v498_v47 = vpop.permute.xlu1 %497 }
 0x1b7   :  { %v544_v44 = vsel %vm154_vm3, %v542_v6, %v498_v47 }
 0x1b8   :  { %v514_v49 = vpop.permute.xlu0 %513  ;;  %v546_v24 = vsel %vm157_vm4, %v544_v44, %v504_v50 }
 0x1b9   :  { %v548_v32 = vsel %vm160_vm5, %v546_v24, %v510_v58 }
 0x1bc   :  { %699 = vrot.lane.b32.xlu2 %v1428_v48, %s1028_s24  ;;  %711 = vrot.lane.b32.xlu1 %v537_v60, %s1028_s24 }
 0x1be   :  { %v558_v46 = vpop.permute.xlu2 %557  ;;  %v508_v2 = vpop.permute.xlu1 %507 }
 0x1bf   :  { %v547_v21 = vsel %vm160_vm5, %v545_v19, %v508_v2  ;;  %v640_v11 = vsel %vm148_vm1, %v1098_v8, %v558_v46 }
 0x1c0   :  { %v522_v4 = vpop.permute.xlu0 %521  ;;  %v549_v27 = vsel %vm163_vm6, %v547_v21, %v514_v49 }
 0x1c1   :  { %v551_v25 = vsel %vm166_vm7, %v549_v27, %v520_v45  ;;  %v672_v45 = vsel %vm154_vm3, %v670_v5, %v1187_v33 }
 0x1c2   :  { %v674_v61 = vsel %vm157_vm4, %v672_v45, 0.0 }
 0x1c4   :  { %713 = vrot.lane.b32.xlu2 %v551_v25, %s1028_s24 }
 0x1c6   :  { %v568_v48 = vpop.permute.xlu2 %567  ;;  %v516_v1 = vpop.permute.xlu1 %515 }
 0x1c7   :  { %v550_v16 = vsel %vm163_vm6, %v548_v32, %v516_v1 }
 0x1c8   :  { %v562_v13 = vpop.permute.xlu0 %561  ;;  %v552_v9 = vsel %vm166_vm7, %v550_v16, %v522_v4  ;;  %v667_v16 = vsel %vm148_vm1, %v1127_v14, %v1162_v23 }
 0x1c9   :  { %717 = vrot.lane.b32.xlu1 %v552_v9, %s1028_s24 }
 0x1ce   :  { %v576_v12 = vpop.permute.xlu2 %575  ;;  %v556_v31 = vpop.permute.xlu1 %555 }
 0x1cf   :  { %v639_v51 = vsel %vm148_vm1, %v1091_v7, %v556_v31 }
 0x1d0   :  { %v570_v0 = vpop.permute.xlu0 %569  ;;  %v641_v57 = vsel %vm151_vm2, %v639_v51, %v562_v13 }
 0x1d1   :  { %v643_v39 = vsel %vm154_vm3, %v641_v57, %v568_v48 }
 0x1d6   :  { %v586_v55 = vpop.permute.xlu2 %585  ;;  %v564_v15 = vpop.permute.xlu1 %563 }
 0x1d7   :  { %v642_v38 = vsel %vm151_vm2, %v640_v11, %v564_v15 }
 0x1d8   :  { %v580_v52 = vpop.permute.xlu0 %579  ;;  %v644_v54 = vsel %vm154_vm3, %v642_v38, %v570_v0 }
 0x1d9   :  { %v646_v58 = vsel %vm157_vm4, %v644_v54, %v576_v12 }
 0x1de   :  { %v594_v10 = vpop.permute.xlu2 %593  ;;  %v574_v37 = vpop.permute.xlu1 %573 }
 0x1df   :  { %v645_v50 = vsel %vm157_vm4, %v643_v39, %v574_v37 }
 0x1e0   :  { %v588_v41 = vpop.permute.xlu0 %587  ;;  %v647_v53 = vsel %vm160_vm5, %v645_v50, %v580_v52 }
 0x1e1   :  { %v649_v17 = vsel %vm163_vm6, %v647_v53, %v586_v55  ;;  %v669_v55 = vsel %vm151_vm2, %v667_v16, %v1174_v28 }
 0x1e2   :  { %v671_v14 = vsel %vm154_vm3, %v669_v55, %v1198_v40 }
 0x1e3   :  { %v673_v28 = vsel %vm157_vm4, %v671_v14, 0.0 }
 0x1e6   :  { %v604_v56 = vpop.permute.xlu2 %603  ;;  %v582_v59 = vpop.permute.xlu1 %581 }
 0x1e7   :  { %v648_v8 = vsel %vm160_vm5, %v646_v58, %v582_v59  ;;  %v793_v59 = vsel %vm157_vm4, %v1165_v26, 0.0 }
 0x1e8   :  { %v650_v7 = vsel %vm163_vm6, %v648_v8, %v588_v41  ;;  %v598_v36 = vpop.permute.xlu0 %597 }
 0x1e9   :  { %v652_v43 = vsel %vm166_vm7, %v650_v7, %v594_v10  ;;  %v653_v19 = vsel %vm148_vm1, %v598_v36, %v604_v56 }
 0x1ea   :  { %731 = vrot.lane.b32.xlu1 %v652_v43, %s1028_s24 }
 0x1ee   :  { %v612_v47 = vpop.permute.xlu2 %611  ;;  %v592_v62 = vpop.permute.xlu1 %591 }
 0x1ef   :  { %v651_v35 = vsel %vm166_vm7, %v649_v17, %v592_v62 }
 0x1f0   :  { %v606_v63 = vpop.permute.xlu0 %605  ;;  %727 = vrot.lane.b32.xlu2 %v651_v35, %s1028_s24 }
 0x1f2   :  { %743 = vrot.lane.b32.xlu1 %v674_v61, %s1028_s24 }
 0x1f6   :  { %v622_v49 = vpop.permute.xlu2 %621  ;;  %v600_v29 = vpop.permute.xlu1 %599 }
 0x1f7   :  { %v654_v4 = vsel %vm148_vm1, %v600_v29, %v606_v63 }
 0x1f8   :  { %v616_v3 = vpop.permute.xlu0 %615  ;;  %v656_v48 = vsel %vm151_vm2, %v654_v4, %v612_v47 }
 0x1fe   :  { %v630_v34 = vpop.permute.xlu2 %629  ;;  %v610_v60 = vpop.permute.xlu1 %609 }
 0x1ff   :  { %v655_v6 = vsel %vm151_vm2, %v653_v19, %v610_v60 }
 0x200   :  { %v624_v18 = vpop.permute.xlu0 %623  ;;  %v657_v44 = vsel %vm154_vm3, %v655_v6, %v616_v3 }
 0x201   :  { %v659_v24 = vsel %vm157_vm4, %v657_v44, %v622_v49 }
 0x206   :  { %v680_v33 = vpop.permute.xlu2 %679  ;;  %v618_v46 = vpop.permute.xlu1 %617 }
 0x207   :  { %v750_v2 = vsel %vm747_vm8, %v680_v33, 0.0  ;;  %v658_v13 = vsel %vm154_vm3, %v656_v48, %v618_v46 }
 0x208   :  { %772 = vst [vmem:[#allocation8 + $0x10] sm:$0xff] %v750_v2  ;;  %v634_v21 = vpop.permute.xlu0 %633  ;;  %v660_v15 = vsel %vm157_vm4, %v658_v13, %v624_v18 }
 0x209   :  { %v662_v52 = vsel %vm160_vm5, %v660_v15, %v630_v34 }
 0x20e   :  { %v686_v27 = vpop.permute.xlu2 %685  ;;  %v628_v25 = vpop.permute.xlu1 %627 }
 0x20f   :  { %v762_v32 = vsel %vm747_vm8, %v686_v27, 0.0  ;;  %v661_v1 = vsel %vm160_vm5, %v659_v24, %v628_v25 }
 0x210   :  { %784 = vst [vmem:[#allocation8 + $0x70] sm:$0xff] %v762_v32  ;;  %v663_v9 = vsel %vm163_vm6, %v661_v1, %v634_v21  ;;  %v682_v12 = vpop.permute.xlu0 %681 }
 0x211   :  { %v751_v31 = vsel %vm747_vm8, %v682_v12, 0.0  ;;  %v665_v0 = vsel %vm166_vm7, %v663_v9, %v1180_v30 }
 0x212   :  { %773 = vst [vmem:[#allocation8 + $0x18] sm:$0xff] %v751_v31  ;;  %729 = vrot.lane.b32.xlu0 %v665_v0, %s1028_s24 }
 0x216   :  { %v700_v23 = vpop.permute.xlu2 %699  ;;  %v636_v11 = vpop.permute.xlu1 %635 }
 0x217   :  { %v763_v10 = vsel %vm747_vm8, %v700_v23, 0.0  ;;  %v664_v37 = vsel %vm163_vm6, %v662_v52, %v636_v11 }
 0x218   :  { %785 = vst [vmem:[#allocation8 + $0x78] sm:$0xff] %v763_v10  ;;  %v696_v30 = vpop.permute.xlu0 %695  ;;  %v666_v38 = vsel %vm166_vm7, %v664_v37, %v1160_v22  ;;  %v792_v22 = vsel %vm157_vm4, %v1155_v20, 0.0 }
 0x219   :  { %v752_v41 = vsel %vm747_vm8, %v696_v30, 0.0  ;;  %733 = vrot.lane.b32.xlu2 %v666_v38, %s1028_s24 }
 0x21a   :  { %774 = vst [vmem:[#allocation8 + $0x20] sm:$0xff] %v752_v41  ;;  %741 = vrot.lane.b32.xlu0 %v673_v28, %s1028_s24 }
 0x21e   :  { %v714_v40 = vpop.permute.xlu2 %713  ;;  %v684_v51 = vpop.permute.xlu1 %683 }
 0x21f   :  { %v755_v54 = vsel %vm747_vm8, %v714_v40, 0.0  ;;  %v761_v57 = vsel %vm747_vm8, %v684_v51, 0.0 }
 0x220   :  { %777 = vst [vmem:[#allocation8 + $0x38] sm:$0xff] %v755_v54  ;;  %v702_v56 = vpop.permute.xlu0 %701 }
 0x221   :  { %783 = vst [vmem:[#allocation8 + $0x68] sm:$0xff] %v761_v57  ;;  %v764_v58 = vsel %vm747_vm8, %v702_v56, 0.0  ;;  %796 = vrot.lane.b32.xlu2 %v792_v22, %s1012_s8 }
 0x222   :  { %786 = vst [vmem:[#allocation8 + $0x80] sm:$0xff] %v764_v58  ;;  %798 = vrot.lane.b32.xlu0 %v793_v59, %s1012_s8 }
 0x226   :  { %v698_v39 = vpop.permute.xlu1 %697 }
 0x227   :  { %v753_v8 = vsel %vm747_vm8, %v698_v39, 0.0 }
 0x228   :  { %775 = vst [vmem:[#allocation8 + $0x28] sm:$0xff] %v753_v8  ;;  %v716_v42 = vpop.permute.xlu0 %715 }
 0x229   :  { %v765_v50 = vsel %vm747_vm8, %v716_v42, 0.0 }
 0x22a   :  { %787 = vst [vmem:[#allocation8 + $0x88] sm:$0xff] %v765_v50 }
 0x22e   :  { %v712_v20 = vpop.permute.xlu1 %711 }
 0x22f   :  { %v754_v7 = vsel %vm747_vm8, %v712_v20, 0.0 }
 0x230   :  { %776 = vst [vmem:[#allocation8 + $0x30] sm:$0xff] %v754_v7 }
 0x23b   :  { %v718_v36 = vpop.permute.xlu1 %717 }
 0x23c   :  { %v766_v43 = vsel %vm747_vm8, %v718_v36, 0.0 }
 0x23d   :  { %788 = vst [vmem:[#allocation8 + $0x90] sm:$0xff] %v766_v43 }
 0x24a   :  { %v728_v26 = vpop.permute.xlu2 %727 }
 0x24b   :  { %v756_v5 = vsel %vm747_vm8, %v728_v26, 0.0 }
 0x24c   :  { %778 = vst [vmem:[#allocation8 + $0x40] sm:$0xff] %v756_v5 }
 0x25c   :  { %v732_v53 = vpop.permute.xlu1 %731 }
 0x25d   :  { %v767_v45 = vsel %vm747_vm8, %v732_v53, 0.0 }
 0x25e   :  { %789 = vst [vmem:[#allocation8 + $0x98] sm:$0xff] %v767_v45 }
 0x264   :  { %v744_v47 = vpop.permute.xlu1 %743 }
 0x265   :  { %v769_v62 = vsel %vm747_vm8, %v744_v47, 0.0 }
 0x266   :  { %791 = vst [vmem:[#allocation8 + $0xa8] sm:$0xff] %v769_v62 }
 0x273   :  { %v734_v17 = vpop.permute.xlu2 %733 }
 0x274   :  { %v768_v35 = vsel %vm747_vm8, %v734_v17, 0.0 }
 0x275   :  { %790 = vst [vmem:[#allocation8 + $0xa0] sm:$0xff] %v768_v35 }
 0x27b   :  { %v797_v63 = vpop.permute.xlu2 %796 }
 0x27c   :  { %v802_v61 = vsel %vm747_vm8, %v797_v63, 0.0 }
 0x27d   :  { %804 = vst [vmem:[#allocation9] sm:$0xff] %v802_v61 }
 0x284   :  { %v730_v49 = vpop.permute.xlu0 %729 }
 0x285   :  { %v757_v29 = vsel %vm747_vm8, %v730_v49, 0.0 }
 0x286   :  { %779 = vst [vmem:[#allocation8 + $0x48] sm:$0xff] %v757_v29 }
 0x28c   :  { %v742_v3 = vpop.permute.xlu0 %741 }
 0x28d   :  { %v758_v34 = vsel %vm747_vm8, %v742_v3, 0.0 }
 0x28e   :  { %780 = vst [vmem:[#allocation8 + $0x50] sm:$0xff] %v758_v34 }
 0x28f   :  { %818 = dma.vmem_to_hbm [thread:$0]  %s811_s26, 2816, %s813_s29, [#allocation4], %s1030_s1, %s1030_s1, %s1022_s18  }
 0x294   :  { %v799_v60 = vpop.permute.xlu0 %798 }
 0x295   :  { %v803_v18 = vsel %vm747_vm8, %v799_v60, 0.0 }
 0x296   :  { %805 = vst [vmem:[#allocation9 + $0x8] sm:$0xff] %v803_v18 }
 0x297   :  { %831 = dma.vmem_to_hbm [thread:$0]  %s824_s0, 256, %s826_s6, [#allocation10], %s1030_s1, %s1030_s1, %s1022_s18  }
 0x298   :  { %998 = dma.done.wait [#allocation4], 2816  }
 0x299   :  { %999 = vsyncadd [#allocation4], 4294964480 }
 0x29a   :  { %1000 = dma.done.wait [#allocation10], 256  }
 0x29b   :  { %1001 = vsyncadd [#allocation10], 4294967040 }
 0x29c   :  { %840 = vsyncpa [#allocation3], 1 }
 0x29d   :  { %841 = vsyncpa [#allocation6], 1 }
 0x29e   :  { %842 = vsyncpa [#allocation4], 1 }
 0x29f   :  { %843 = vsyncpa [#allocation10], 1 }

</bundles_post_ra>
